<compile_context>
chip_gen: v7x
topology: tpu7x:2x2x1
jax: 0.10.0
libtpu: 0.0.40
codegen_flags: <defaults>
</compile_context>

<pallas_src>
import functools

import jax
import jax.numpy as jnp
from jax.experimental import pallas as pl
from jax.experimental.pallas import tpu as pltpu

LANE = 128

# Feature operand kept fully VMEM-resident when it fits this budget.
_RESIDENT_FEAT_BUDGET = 8 << 20  # 8 MiB


def _round_up(x, m):
    return ((x + m - 1) // m) * m


def _divisor_tile(n_pad, want):
    """Largest multiple of LANE that divides n_pad and is <= want."""
    t = max(LANE, (min(want, n_pad) // LANE) * LANE)
    while t > LANE and n_pad % t != 0:
        t -= LANE
    return t


# ----------------------------- Pallas kernels -------------------------------

def _agg_relu_kernel(a_ref, xw_ref, b_ref, h_ref, acc_ref, *, tk, resident):
    """One (row-tile, k-tile) step of  H = relu(A_hat @ XW1 + b1)."""
    k = pl.program_id(1)

    @pl.when(k == 0)
    def _():
        acc_ref[...] = jnp.zeros_like(acc_ref)

    if resident:
        start = pl.multiple_of(k * tk, LANE)
        xw = xw_ref[pl.ds(start, tk), :]
    else:
        xw = xw_ref[...]
    acc_ref[...] += jnp.dot(a_ref[...], xw, preferred_element_type=jnp.float32)

    @pl.when(k == pl.num_programs(1) - 1)
    def _():
        # TODO(synk): F.dropout(training=True) is stochastic; implemented as
        # eval-mode identity (deterministic forward).
        h_ref[...] = jnp.maximum(acc_ref[...] + b_ref[...], 0.0).astype(h_ref.dtype)


def _agg_logsoftmax_kernel(a_ref, xw_ref, b_ref, o_ref, *, tk, resident,
                           num_classes):
    """One (row-tile, k-tile) step of out = log_softmax(A_hat @ HW2 + b2).

    Accumulates directly into the resident f32 output block (no scratch)."""
    k = pl.program_id(1)

    if resident:
        start = pl.multiple_of(k * tk, LANE)
        xw = xw_ref[pl.ds(start, tk), :]
    else:
        xw = xw_ref[...]
    part = jnp.dot(a_ref[...], xw, preferred_element_type=jnp.float32)

    @pl.when(k == 0)
    def _():
        o_ref[...] = part

    @pl.when(k > 0)
    def _():
        o_ref[...] += part

    @pl.when(k == pl.num_programs(1) - 1)
    def _():
        z = o_ref[...] + b_ref[...]
        # Mask zero-padded class lanes so they don't contaminate max / sum.
        lane = jax.lax.broadcasted_iota(jnp.int32, z.shape, dimension=1)
        valid = lane < num_classes
        z = jnp.where(valid, z, jnp.float32(-1e30))
        m = jnp.max(z, axis=1, keepdims=True)
        zs = z - m
        e = jnp.where(valid, jnp.exp(zs), 0.0)
        lse = jnp.log(jnp.sum(e, axis=1, keepdims=True))
        o_ref[...] = jnp.where(valid, zs - lse, 0.0)


# ------------------------------ pallas_call glue -----------------------------

def _agg_call(kernel, a, xw, b, out_dtype, *, tm, tk, use_acc_scratch,
              transcendentals=0):
    """Tiled  out = f(A_hat @ XW + b)  over grid (row tiles, k tiles)."""
    n_pad = a.shape[0]
    c_out = xw.shape[1]
    grid = (n_pad // tm, n_pad // tk)

    feat_bytes = xw.size * xw.dtype.itemsize
    resident = feat_bytes <= _RESIDENT_FEAT_BUDGET
    if resident:
        feat_spec = pl.BlockSpec((n_pad, c_out), lambda i, k: (0, 0))
    else:
        feat_spec = pl.BlockSpec((tk, c_out), lambda i, k: (k, 0))

    scratch = [pltpu.VMEM((tm, c_out), jnp.float32)] if use_acc_scratch else []

    out_itemsize = jnp.dtype(out_dtype).itemsize
    flops = 2 * n_pad * n_pad * c_out
    bytes_accessed = (a.size * a.dtype.itemsize
                      + feat_bytes * (1 if resident else grid[0])
                      + b.size * b.dtype.itemsize
                      + n_pad * c_out * out_itemsize)

    # VMEM working set: double-buffered A & out, (possibly double-buffered)
    # feature operand, resident accumulator, bias. Explicit limit, capped for
    # v7x's 64 MiB physical VMEM.
    vmem_est = (2 * tm * tk * a.dtype.itemsize
                + 2 * (feat_bytes if resident else tk * c_out * xw.dtype.itemsize)
                + (tm * c_out * 4 if use_acc_scratch else 0)
                + 2 * tm * c_out * out_itemsize
                + 2 * b.size * b.dtype.itemsize)
    vmem_limit = min(max(32 << 20, int(vmem_est * 1.5) + (2 << 20)), 64 << 20)

    return pl.pallas_call(
        functools.partial(kernel, tk=tk, resident=resident),
        out_shape=jax.ShapeDtypeStruct((n_pad, c_out), out_dtype),
        grid_spec=pltpu.PrefetchScalarGridSpec(
            num_scalar_prefetch=0,
            grid=grid,
            in_specs=[
                pl.BlockSpec((tm, tk), lambda i, k: (i, k)),    # A_hat stream
                feat_spec,                                      # XW (resident)
                pl.BlockSpec((1, c_out), lambda i, k: (0, 0)),  # bias (pinned)
            ],
            out_specs=pl.BlockSpec((tm, c_out), lambda i, k: (i, 0)),
            scratch_shapes=scratch,
        ),
        compiler_params=pltpu.CompilerParams(
            dimension_semantics=("parallel", "arbitrary"),
            vmem_limit_bytes=vmem_limit),
        cost_estimate=pl.CostEstimate(
            flops=int(flops),
            transcendentals=int(transcendentals),
            bytes_accessed=int(bytes_accessed)),
    )(a, xw, b)


def gcn_forward(a_hat, x, w1, b1, w2, b2, *, tile_m=1024, tile_k=1024):
    """Full 2-layer GCN forward. a_hat: (N, N) f32 dense normalized adjacency."""
    n = x.shape[0]
    cin, hid = w1.shape
    cout = w2.shape[1]

    # Pad only to lane granularity (no lcm blowup on the O(N^2) adjacency).
    n_pad = _round_up(n, LANE)
    cin_p = _round_up(cin, LANE)
    hid_p = _round_up(hid, LANE)
    cout_p = _round_up(cout, LANE)

    # Tiles must divide n_pad; keep >=2 row tiles when possible so the
    # "parallel" axis can shard across v7x's two TensorCores.
    tm_want = min(tile_m, n_pad)
    if n_pad >= 2 * LANE:
        tm_want = min(tm_want, n_pad // 2)
    tm = _divisor_tile(n_pad, tm_want)
    tk = _divisor_tile(n_pad, min(tile_k, n_pad))

    # Zero-pad to lane granularity. Padded A rows & cols are zero, so padded
    # nodes never contribute to real rows (even though padded H rows may hold
    # relu(b1) != 0); bf16 for the MXU streams, f32 accumulation in-kernel.
    a_p = jnp.pad(a_hat, ((0, n_pad - n), (0, n_pad - n))).astype(jnp.bfloat16)
    x_p = jnp.pad(x, ((0, n_pad - n), (0, cin_p - cin))).astype(jnp.bfloat16)
    w1_p = jnp.pad(w1, ((0, cin_p - cin), (0, hid_p - hid))).astype(jnp.bfloat16)
    b1_p = jnp.pad(b1, ((0, 0), (0, hid_p - hid))).astype(jnp.float32)
    w2_p = jnp.pad(w2, ((0, hid_p - hid), (0, cout_p - cout))).astype(jnp.bfloat16)
    b2_p = jnp.pad(b2, ((0, 0), (0, cout_p - cout))).astype(jnp.float32)

    # Feature transform hoisted out of the streamed kernel: computed once
    # instead of once per row tile.
    xw1 = jnp.dot(x_p, w1_p, preferred_element_type=jnp.float32).astype(jnp.bfloat16)

    # Layer 1: H = relu(A_hat @ XW1 + b1)   (bf16, lane-dense, feeds layer 2)
    h = _agg_call(_agg_relu_kernel, a_p, xw1, b1_p, jnp.bfloat16,
                  tm=tm, tk=tk, use_acc_scratch=True)

    hw2 = jnp.dot(h, w2_p, preferred_element_type=jnp.float32).astype(jnp.bfloat16)

    # Layer 2: out = log_softmax(A_hat @ HW2 + b2), accumulated directly in
    # the resident f32 output block.
    out = _agg_call(
        functools.partial(_agg_logsoftmax_kernel, num_classes=cout),
        a_p, hw2, b2_p, jnp.float32, tm=tm, tk=tk, use_acc_scratch=False,
        transcendentals=n_pad * (cout_p + 1))
    return out[:n, :cout]


# -------------------------------- JAX glue -----------------------------------

def build_normalized_adjacency(edge_index, num_nodes):
    """Dense A_hat = D^-1/2 (A + I) D^-1/2, matching PyG gcn_norm with
    add_self_loops=True and unit edge weights (symmetric normalization)."""
    src, dst = edge_index[0], edge_index[1]
    loops = jnp.arange(num_nodes, dtype=src.dtype)
    src = jnp.concatenate([src, loops])
    dst = jnp.concatenate([dst, loops])
    adj = jnp.zeros((num_nodes, num_nodes), jnp.float32).at[dst, src].add(1.0)
    deg = adj.sum(axis=1)
    dinv = jnp.where(deg > 0, jax.lax.rsqrt(deg), 0.0)
    return dinv[:, None] * adj * dinv[None, :]


def init_params(key, in_channels, hidden_channels, out_channels):
    """Deterministic glorot-style init (GCNConv: weight + bias per layer)."""
    k1, k2 = jax.random.split(key)

    def glorot(k, fan_in, fan_out):
        lim = jnp.sqrt(6.0 / (fan_in + fan_out))
        return jax.random.uniform(k, (fan_in, fan_out), jnp.float32, -lim, lim)

    w1 = glorot(k1, in_channels, hidden_channels)
    b1 = jnp.zeros((1, hidden_channels), jnp.float32)
    w2 = glorot(k2, hidden_channels, out_channels)
    b2 = jnp.zeros((1, out_channels), jnp.float32)
    return w1, b1, w2, b2


def gcn_reference(a_hat, x, w1, b1, w2, b2):
    """Plain-JAX f32 reference of the forward pass."""
    h = jnp.maximum(a_hat @ (x @ w1) + b1, 0.0)
    z = a_hat @ (h @ w2) + b2
    return jax.nn.log_softmax(z, axis=1)


# ---------------------------------- demo -------------------------------------

if __name__ == "__main__":
    num_nodes = 512
    num_edges = 2048
    in_channels, hidden_channels, out_channels = 16, 32, 4

    key = jax.random.PRNGKey(0)
    k_x, k_e, k_p = jax.random.split(key, 3)

    x = jax.random.normal(k_x, (num_nodes, in_channels), jnp.float32)
    edge_index = jax.random.randint(k_e, (2, num_edges), 0, num_nodes, jnp.int32)

    w1, b1, w2, b2 = init_params(k_p, in_channels, hidden_channels, out_channels)
    a_hat = build_normalized_adjacency(edge_index, num_nodes)

    # Small tiles so the demo exercises the (row, contraction) grid and the
    # accumulator init/finalize path; production defaults are 1024.
    out = gcn_forward(a_hat, x, w1, b1, w2, b2, tile_m=256, tile_k=256)
    out = jax.block_until_ready(out)

    assert out.shape == (num_nodes, out_channels)

    # log_softmax rows must sum to 1 in prob space.
    row_sums = jnp.sum(jnp.exp(out), axis=1)
    assert bool(jnp.all(jnp.abs(row_sums - 1.0) < 1e-3))

    # Loose check against the plain-JAX f32 reference (kernel streams bf16).
    ref = gcn_reference(a_hat, x, w1, b1, w2, b2)
    max_err = float(jnp.max(jnp.abs(out - ref)))
    assert max_err < 0.15, f"max |out - ref| = {max_err}"

    print("KERNEL_OK")
</pallas_src>

<mosaic_0001>
module attributes {stable_mosaic.version = 11 : i64} {
  func.func @_agg_relu_kernel(%arg0: i32, %arg1: i32, %arg2: memref<256x256xbf16, #tpu.memory_space<vmem>>, %arg3: memref<512x128xbf16, #tpu.memory_space<vmem>>, %arg4: memref<1x128xf32, #tpu.memory_space<vmem>>, %arg5: memref<256x128xbf16, #tpu.memory_space<vmem>>, %arg6: memref<256x128xf32, #tpu.memory_space<vmem>>) attributes {dimension_semantics = [#tpu.dimension_semantics<parallel>, #tpu.dimension_semantics<arbitrary>], iteration_bounds = array<i64: 2, 2>, scalar_prefetch = 0 : i64, scratch_operands = 1 : i64, tpu.core_type = #tpu.core_type<tc>, window_params = [{transform_indices = @transform_0, window_bounds = array<i64: 256, 256>}, {pipeline_mode = #tpu.pipeline_mode<synchronous>, transform_indices = @transform_1, window_bounds = array<i64: 512, 128>}, {pipeline_mode = #tpu.pipeline_mode<synchronous>, transform_indices = @transform_2, window_bounds = array<i64: 1, 128>}, {transform_indices = @transform_3, window_bounds = array<i64: 256, 128>}]} {
    %c0_i32 = arith.constant 0 : i32
    %0 = arith.cmpi eq, %arg1, %c0_i32 : i32
    %1 = arith.extui %0 : i1 to i32
    %c0_i32_0 = arith.constant 0 : i32
    %2 = arith.cmpi ne, %1, %c0_i32_0 : i32
    scf.if %2 {
      %cst_8 = arith.constant 0.000000e+00 : f32
      %15 = vector.broadcast %cst_8 : f32 to vector<256x128xf32>
      %c0_9 = arith.constant 0 : index
      %c0_10 = arith.constant 0 : index
      %16 = vector.load %arg6[%c0_9, %c0_10] : memref<256x128xf32, #tpu.memory_space<vmem>>, vector<256x128xf32>
      tpu.vector_store %arg6[%c0_9, %c0_10], %15 {strides = array<i32>} : memref<256x128xf32, #tpu.memory_space<vmem>>, vector<256x128xf32>,
    } else {
    }
    %c256_i32 = arith.constant 256 : i32
    %3 = arith.muli %arg1, %c256_i32 : i32
    %4 = tpu.assume_multiple %3, 128 : i32
    %5 = arith.index_cast %4 : i32 to index
    %c0 = arith.constant 0 : index
    %6 = vector.load %arg3[%5, %c0] : memref<512x128xbf16, #tpu.memory_space<vmem>>, vector<256x128xbf16>
    %c0_1 = arith.constant 0 : index
    %c0_2 = arith.constant 0 : index
    %7 = vector.load %arg6[%c0_1, %c0_2] : memref<256x128xf32, #tpu.memory_space<vmem>>, vector<256x128xf32>
    %c0_3 = arith.constant 0 : index
    %c0_4 = arith.constant 0 : index
    %8 = vector.load %arg2[%c0_3, %c0_4] : memref<256x256xbf16, #tpu.memory_space<vmem>>, vector<256x256xbf16>
    %cst = arith.constant dense<0.000000e+00> : vector<256x128xf32>
    %9 = tpu.matmul %8, %6, %cst {dimension_numbers = #tpu.dot_dimension_numbers<[1], [0], [0], [1], [0, 0, 1, 1], [], []>} : vector<256x256xbf16>, vector<256x128xbf16>, vector<256x128xf32> -> vector<256x128xf32>
    %10 = arith.addf %7, %9 : vector<256x128xf32>
    %c0_5 = arith.constant 0 : index
    %c0_6 = arith.constant 0 : index
    %11 = vector.load %arg6[%c0_5, %c0_6] : memref<256x128xf32, #tpu.memory_space<vmem>>, vector<256x128xf32>
    tpu.vector_store %arg6[%c0_5, %c0_6], %10 {strides = array<i32>} : memref<256x128xf32, #tpu.memory_space<vmem>>, vector<256x128xf32>,
    %c1_i32 = arith.constant 1 : i32
    %12 = arith.cmpi eq, %arg1, %c1_i32 : i32
    %13 = arith.extui %12 : i1 to i32
    %c0_i32_7 = arith.constant 0 : i32
    %14 = arith.cmpi ne, %13, %c0_i32_7 : i32
    scf.if %14 {
      %c0_8 = arith.constant 0 : index
      %c0_9 = arith.constant 0 : index
      %15 = vector.load %arg6[%c0_8, %c0_9] : memref<256x128xf32, #tpu.memory_space<vmem>>, vector<256x128xf32>
      %c0_10 = arith.constant 0 : index
      %c0_11 = arith.constant 0 : index
      %16 = vector.load %arg4[%c0_10, %c0_11] : memref<1x128xf32, #tpu.memory_space<vmem>>, vector<1x128xf32>
      %17 = vector.broadcast %16 : vector<1x128xf32> to vector<256x128xf32>
      %18 = arith.addf %15, %17 : vector<256x128xf32>
      %cst_12 = arith.constant 0.000000e+00 : f32
      %19 = vector.broadcast %cst_12 : f32 to vector<256x128xf32>
      %20 = arith.maximumf %18, %19 : vector<256x128xf32>
      %21 = arith.truncf %20 : vector<256x128xf32> to vector<256x128xbf16>
      %c0_13 = arith.constant 0 : index
      %c0_14 = arith.constant 0 : index
      %22 = vector.load %arg5[%c0_13, %c0_14] : memref<256x128xbf16, #tpu.memory_space<vmem>>, vector<256x128xbf16>
      tpu.vector_store %arg5[%c0_13, %c0_14], %21 {strides = array<i32>} : memref<256x128xbf16, #tpu.memory_space<vmem>>, vector<256x128xbf16>,
    } else {
    }
    return
  }
  func.func @transform_0(%arg0: i32, %arg1: i32) -> (i32, i32) {
    %c0_i32 = arith.constant 0 : i32
    return %arg0, %arg1 : i32, i32
  }
  func.func @transform_1(%arg0: i32, %arg1: i32) -> (i32, i32) {
    %c0_i32 = arith.constant 0 : i32
    %c0_i32_0 = arith.constant 0 : i32
    %c0_i32_1 = arith.constant 0 : i32
    return %c0_i32, %c0_i32_0 : i32, i32
  }
  func.func @transform_2(%arg0: i32, %arg1: i32) -> (i32, i32) {
    %c0_i32 = arith.constant 0 : i32
    %c0_i32_0 = arith.constant 0 : i32
    %c0_i32_1 = arith.constant 0 : i32
    return %c0_i32, %c0_i32_0 : i32, i32
  }
  func.func @transform_3(%arg0: i32, %arg1: i32) -> (i32, i32) {
    %c0_i32 = arith.constant 0 : i32
    %c0_i32_0 = arith.constant 0 : i32
    return %arg0, %c0_i32 : i32, i32
  }
}

</mosaic_0001>

<bundles_post_ra>
// kernel: tpu_custom_call.1
= control target key start
LH: loop header
LB: loop body
LE: loop exit
PB: predicated region body
PF: predicated region fallthrough
CT: control target
= control target key end

     0   :  { %s2365_s0 = inlined_call_operand.hbm [shape: bf16[512,512], index: 0, kind: input, shape index: {}]   ;;  %s2366_s1 = inlined_call_operand.hbm [shape: bf16[512,128], index: 1, kind: input, shape index: {}]   ;;  %s2367_s2 = inlined_call_operand.vmem [shape: f32[1,128], index: 2, kind: input, shape index: {}]   ;;  %s2368_s3 = inlined_call_operand.hbm [shape: bf16[512,128], index: 3, kind: output, shape index: {}]  }
   0x1   :  { %2380 = sst [smem:[#allocation17_spill]] %s2366_s1 }
   0x2   :  { %8 = vsyncpa [#allocation4], 0 }
   0x3   :  { %10 = vsyncpa [#allocation4 + $0x1], 0 }
   0x4   :  { %11 = vsyncpa [#allocation7], 0 }
   0x5   :  { %12 = vsyncpa [#allocation5], 0 }
   0x6   :  { %14 = vsyncpa [#allocation5 + $0x1], 0  ;;  %s1986_s12 = smov 0   ;;  %s1988_s13 = smov 0  }
   0x7   :  { %s1990_s14 = smov 0   ;;  %s1992_s15 = smov 0  }
   0x8   :  { %s1994_s16 = smov 0   ;;  %s1996_s17 = smov 0  }
   0x9   :  { %s1998_s18 = smov 0   ;;  %s2000_s19 = smov 0  }
   0xa   :  { %s2002_s20 = smov 0   ;;  %s2004_s21 = smov 0  }
   0xb   :  { %s2006_s22 = smov 0  }
   0xc LB: > { %2381 = sst [smem:[#allocation12_spill]] %s1913_s12  ;;  %s1223_s23 = sadd.s32 4294967295, %s1953_s22   ;;  %s1953_s22 = sphi %s2006_s22, %s20_s22   ;;  %s1949_s21 = sphi %s2004_s21, %s2415_s21   ;;  %s1945_s20 = sphi %s2002_s20, %s2406_s20   ;;  %s1941_s19 = sphi %s2000_s19, %s2414_s19   ;;  %s1937_s18 = sphi %s1998_s18, %s2405_s18   ;;  %s1933_s17 = sphi %s1996_s17, %s2413_s17   ;;  %s1929_s16 = sphi %s1994_s16, %s2412_s16   ;;  %s1925_s15 = sphi %s1992_s15, %s2411_s15   ;;  %s1921_s14 = sphi %s1990_s14, %s2410_s14   ;;  %s1917_s13 = sphi %s1988_s13, %s2409_s13   ;;  %s1913_s12 = sphi %s1986_s12, %s2408_s12  }
   0xd   : > { %2382 = sst [smem:[#allocation13_spill]] %s1945_s20  ;;  %s1224_s24 = sadd.s32 4294967294, %s1953_s22  }
   0xe   : > { %p48_p0 = scmp.ne.s32.totalorder %s1933_s17, %s1929_s16  ;;  %p49_p1 = scmp.eq.s32.totalorder %s1953_s22, 0 }
   0xf   : > { %p54_p2 = scmp.ne.s32.totalorder %s1929_s16, %s1925_s15  ;;  %p2046_p3 = scmp.eq.s32.totalorder %s1223_s23, 0 }
  0x10   : > { %p2051_p4 = por %p49_p1, %p48_p0  ;;  %p119_p5 = scmp.ne.s32.totalorder %s1921_s14, %s1917_s13 }
  0x11   : > { %s2383_s26 = scalar_select %p2046_p3, 1, 0 }
  0x12   : > { %p2059_p6 = por %p2046_p3, %p54_p2  ;;  %p120_p7 = scmp.eq.s32.totalorder %s1223_s23, 3 }
  0x13   : > { %p125_p8 = scmp.ne.s32.totalorder %s1917_s13, %s1913_s12  ;;  %p126_p9 = scmp.eq.s32.totalorder %s1224_s24, 3 }
  0x14   : > { %s2385_s29 = scalar_select %p2059_p6, 1, 0 }
  0x15   : > { %p2065_p10 = por %p120_p7, %p119_p5  ;;  %p1225_p11 = scmp.ge.s32.totalorder %s1953_s22, 1 }
  0x16   : > { %p2070_p12 = por %p126_p9, %p125_p8  ;;  %p133_p13 = scmp.lt.s32.totalorder %s1953_s22, 5 }
  0x17   : > { %s2386_s30 = scalar_select %p2065_p10, 1, 0 }
  0x18   : > { %s2387_s4 = scalar_select %p2070_p12, 1, 0 }
  0x19   : > { %p2075_p0 = pnand %p1225_p11, %p133_p13  ;;  %s1955_s6 = smov [#allocation6]  }
  0x1a   : > { %2388 = sst [smem:[#allocation14_spill]] %s2387_s4  ;;  %s145_s7 = sshll.u32 %s1955_s6, 4  ;;  %s146_s7 = int_to_ptr.vmem [resolvable:$true] %s145_s7 }
  0x1b   : > { %s2389_s5 = scalar_select %p2075_p0, 1, 0 }
  0x1c   : > { %p1592_p1 = pneg %p2075_p0  ;;  %p1605_p2 = scmp.lt.s32.totalorder %s1953_s22, 4 }
  0x1d   : > { %s2392_s1 = sld [smem:[#allocation17_spill]] }
  0x1e   : > { %p2084_p5 = pnand %p1592_p1, %p2046_p3  ;;  %p2090_p7 = pnand %p1605_p2, %p2051_p4 }
  0x20   : > { %s2391_s9 = scalar_select %p2090_p7, 1, 0 }
  0x21   : > { %p1771_p9 = pneg %p2084_p5 }
  0x23   : > { %s1769_s15 = scalar_lea.hbm %s2392_s1, 4096 }
  0x24   : > { %p1770_p8 = scmp.ne.s32.totalorder %s2392_s1, %s1769_s15  ;;  %p1776_p1 = scmp.lt.u32.totalorder %s1769_s15, %s2392_s1 }
  0x26   : > { %p1772_p11 = pnand %p1771_p9, %p1770_p8 }
  0x28   : > { %p1773_p13 = pneg %p1772_p11 }
  0x2a   : > { %p1778_p4 = pnand %p1776_p1, %p1773_p13 }
  0x2c   : > { %1781 = shalt.err (!%p1778_p4)
}
  0x2d   : > { %s1782_s28 = scalar_lea.vmem %s146_s7, 4096  ;;  %p1790_p3 = scmp.lt.s32.totalorder %s146_s7, %s146_s7 }
  0x2e   : > { %p1783_p2 = scmp.ne.s32.totalorder %s146_s7, %s1782_s28  ;;  %p1791_p6 = scmp.lt.s32.totalorder %s1782_s28, %s1782_s28 }
  0x30   : > { %p1785_p12 = pnand %p1783_p2, %p1771_p9  ;;  %p1792_p0 = por %p1791_p6, %p1790_p3 }
  0x32   : > { %p1786_p10 = pneg %p1785_p12 }
  0x34   : > { %p1793_p7 = pnand %p1792_p0, %p1786_p10 }
  0x36   : > { %1796 = shalt.err (!%p1793_p7)
}
  0x37   : > { %s1956_s10 = smov 64   ;;  %s1957_s25 = smov 4  }
  0x38   : > { %1595 = dma.hbm_to_vmem [thread:$0]  (!%p2084_p5), %s2392_s1, 4096, %s146_s7, [#allocation7], %s1956_s10, %s1956_s10, %s1957_s25  }
  0x39   : > { %s29_s23 = sadd.s32 1, %s1945_s20  ;;  %s32_s24 = sadd.s32 1, %s1949_s21 }
  0x3a   : > { %p30_p3 = scmp.ge.s32.totalorder %s29_s23, 2  ;;  %s162_s6 = sand.u32 1, %s1933_s17  }
  0x3b   : > { %s1228_s28 = sshll.u32 %s162_s6, 8  ;;  %s1230_s8 = sshll.u32 %s1945_s20, 1 }
  0x3c   : > { %s2417_s23 = smov (%p30_p3, %s29_s23), 0  ;;  %s2419_s24 = smov (!%p30_p3, %s32_s24), %s1949_s21 }
  0x3d   : > { %2393 = sst [smem:[#allocation15_spill]] %s2417_s23  ;;  %s37_s27 = ssub.s32 %s1945_s20, %s2417_s23 }
  0x3e   : > { %p34_p6 = scmp.ge.s32.totalorder %s2419_s24, 2  ;;  %s1327_s4 = sshll.u32 %s1949_s21, 7 }
  0x3f   : > { %s166_s11 = scalar_lea.vmem [#allocation3], %s1228_s28  ;;  %s173_s10 = sadd.s32 %s1327_s4, %s1230_s8 }
  0x40   : > { %s176_s7 = sshll.u32 %s166_s11, 4  ;;  %s2421_s24 = smov (%p34_p6, %s2419_s24), 0  ;;  %s2122_s7 = int_to_ptr.vmem [resolvable:$true] %s176_s7 }
  0x41   : > { %2394 = sst [smem:[#allocation16_spill]] %s2421_s24  ;;  %s36_s25 = ssub.s32 %s1949_s21, %s2421_s24 }
  0x42   : > { %s1232_s15 = sshll.u32 %s173_s10, 6  ;;  %s38_s1 = sor.u32 %s37_s27, %s36_s25 }
  0x43   : > { %p107_p10 = scmp.eq.s32.totalorder %s36_s25, 0  ;;  %p39_p12 = scmp.eq.s32.totalorder %s38_s1, 0 }
  0x44   : > { %s2129_s20 = scalar_lea.hbm %s2365_s0, %s1232_s15  ;;  %s2395_s28 = sadd.s32 1, %s1921_s14 }
  0x45   : > { %s2134_s11 = scalar_select %p107_p10, %s1921_s14, %s2395_s28  }
  0x46   : > { %s2396_s4 = sadd.s32 1, %s1933_s17  ;;  %s2141_s24 = scalar_lea.sflag [#allocation4], %s162_s6 }
  0x47   : > { %s2139_s8 = scalar_select %p39_p12, %s1933_s17, %s2396_s4  }
  0x48   : > { %s1797_s27 = scalar_lea.hbm %s2129_s20, 4096  ;;  %p2397_p5 = scmp.ne.s32.totalorder %s2391_s9, 0 }
  0x49   : > { %p1798_p0 = scmp.ne.s32.totalorder %s2129_s20, %s1797_s27  ;;  %s1802_s23 = scalar_lea.hbm %s2365_s0, 16384 }
  0x4a   : > { %p1799_p7 = pneg %p2397_p5  ;;  %p1803_p11 = scmp.lt.u32.totalorder %s2129_s20, %s2365_s0 }
  0x4b   : > { %p1804_p13 = scmp.lt.u32.totalorder %s1802_s23, %s1797_s27  ;;  %p1806_p4 = scmp.lt.u32.totalorder %s1797_s27, %s2129_s20 }
  0x4c   : > { %p1800_p8 = pnand %p1799_p7, %p1798_p0 }
  0x4d   : > { %p1805_p1 = por %p1804_p13, %p1803_p11 }
  0x4e   : > { %p1801_p9 = pneg %p1800_p8 }
  0x4f   : > { %p1807_p2 = por %p1806_p4, %p1805_p1 }
  0x51   : > { %p1808_p3 = pnand %p1807_p2, %p1801_p9 }
  0x53   : > { %1811 = shalt.err (!%p1808_p3)
}
  0x54   : > { %s1812_s6 = scalar_lea.vmem %s2122_s7, 4096  ;;  %s1958_s15 = smov [#allocation3]  }
  0x55   : > { %p1813_p6 = scmp.ne.s32.totalorder %s2122_s7, %s1812_s6  ;;  %s1817_s28 = sshll.u32 %s1958_s15, 4  ;;  %s1818_s28 = int_to_ptr.vmem [resolvable:$false] %s1817_s28 }
  0x56   : > { %s1819_s4 = scalar_lea.vmem %s1818_s28, 8192  ;;  %p1820_p0 = scmp.lt.s32.totalorder %s2122_s7, %s1818_s28 }
  0x57   : > { %p1815_p10 = pnand %p1813_p6, %p1799_p7  ;;  %p1821_p8 = scmp.lt.s32.totalorder %s1819_s4, %s1812_s6 }
  0x59   : > { %p1816_p12 = pneg %p1815_p10  ;;  %p1822_p11 = por %p1821_p8, %p1820_p0 }
  0x5b   : > { %p1823_p13 = pnand %p1822_p11, %p1816_p12 }
  0x5d   : > { %1826 = shalt.err (!%p1823_p13)
}
  0x5e   : > { %s1959_s27 = smov 256   ;;  %s1960_s1 = smov 128  }
  0x5f   : > { %s1961_s12 = smov 8   ;;  %p2398_p7 = scmp.ne.s32.totalorder %s2389_s5, 0 }
  0x60   : > { %1599 = dma.hbm_to_vmem [thread:$0]  (!%p2397_p5), %s2129_s20, 4096, %s2122_s7, %s2141_s24, %s1959_s27, %s1960_s1, %s1961_s12  }
  0x61   : > { %188 = sbr.rel (%p2398_p7) target bundleno = 480 (0x1e0), region = 32  ;;  %s190_s23 = sand.u32 (!%p2398_p7), 1, %s1929_s16  }
  0x62   : > { %s1234_s10 = sshll.u32 (!%p2398_p7), %s190_s23, 8  ;;  %s191_s25 = scalar_lea.sflag (!%p2398_p7), [#allocation4], %s190_s23 }
  0x63   : > { %s2172_s6 = scalar_lea.vmem (!%p2398_p7), [#allocation3], %s1234_s10  ;;  %p2399_p9 = scmp.ne.s32.totalorder (!%p2398_p7), %s2385_s29, 0 }
  0x68   : > { %1900 = dma.done.wait (%p2399_p9), %s191_s25, 4096  }
  0x69   : > { %1902 = vsyncadd (%p2399_p9), %s191_s25, 4294963200  ;;  %p2400_p1 = scmp.ne.s32.totalorder %s2383_s26, 0 }
  0x6b   : > { %1904 = dma.done.wait (%p2400_p1), [#allocation7], 4096  }
  0x6c   : > { %1906 = vsyncadd (%p2400_p1), [#allocation7], 4294963200  ;;  %s218_s20 = sand.u32 1, %s1917_s13   ;;  %p1237_p5 = scmp.ne.s32.totalorder %s1937_s18, 0 }
  0x6d   : > { %s1236_s5 = sshll.u32 %s218_s20, 7  ;;  %v1962_v0 = vmov (!%p1237_p5), 0.0  }
  0x6e   : > { %s2185_s9 = scalar_lea.vmem [#allocation8], %s1236_s5  ;;  %228 = sbr.rel (%p1237_p5) target bundleno = 126 (0x7e), region = 44  ;;  %229 = vst [vmem:[#allocation2] sm:$0xff] (!%p1237_p5), %v1962_v0  ;;  %230 = vst [vmem:[#allocation2 + $0x8] sm:$0xff] (!%p1237_p5), %v1962_v0 }
  0x6f   : > { %231 = vst [vmem:[#allocation2 + $0x10] sm:$0xff] (!%p1237_p5), %v1962_v0  ;;  %232 = vst [vmem:[#allocation2 + $0x18] sm:$0xff] (!%p1237_p5), %v1962_v0 }
  0x70   : > { %233 = vst [vmem:[#allocation2 + $0x20] sm:$0xff] (!%p1237_p5), %v1962_v0  ;;  %234 = vst [vmem:[#allocation2 + $0x28] sm:$0xff] (!%p1237_p5), %v1962_v0 }
  0x71   : > { %235 = vst [vmem:[#allocation2 + $0x30] sm:$0xff] (!%p1237_p5), %v1962_v0  ;;  %236 = vst [vmem:[#allocation2 + $0x38] sm:$0xff] (!%p1237_p5), %v1962_v0 }
  0x72   : > { %237 = vst [vmem:[#allocation2 + $0x40] sm:$0xff] (!%p1237_p5), %v1962_v0  ;;  %238 = vst [vmem:[#allocation2 + $0x48] sm:$0xff] (!%p1237_p5), %v1962_v0 }
  0x73   : > { %239 = vst [vmem:[#allocation2 + $0x50] sm:$0xff] (!%p1237_p5), %v1962_v0  ;;  %240 = vst [vmem:[#allocation2 + $0x58] sm:$0xff] (!%p1237_p5), %v1962_v0 }
  0x74   : > { %241 = vst [vmem:[#allocation2 + $0x60] sm:$0xff] (!%p1237_p5), %v1962_v0  ;;  %242 = vst [vmem:[#allocation2 + $0x68] sm:$0xff] (!%p1237_p5), %v1962_v0 }
  0x75   : > { %243 = vst [vmem:[#allocation2 + $0x70] sm:$0xff] %v1962_v0  ;;  %244 = vst [vmem:[#allocation2 + $0x78] sm:$0xff] %v1962_v0 }
  0x76   : > { %245 = vst [vmem:[#allocation2 + $0x80] sm:$0xff] %v1962_v0  ;;  %246 = vst [vmem:[#allocation2 + $0x88] sm:$0xff] %v1962_v0 }
  0x77   : > { %247 = vst [vmem:[#allocation2 + $0x90] sm:$0xff] %v1962_v0  ;;  %248 = vst [vmem:[#allocation2 + $0x98] sm:$0xff] %v1962_v0 }
  0x78   : > { %249 = vst [vmem:[#allocation2 + $0xa0] sm:$0xff] %v1962_v0  ;;  %250 = vst [vmem:[#allocation2 + $0xa8] sm:$0xff] %v1962_v0 }
  0x79   : > { %251 = vst [vmem:[#allocation2 + $0xb0] sm:$0xff] %v1962_v0  ;;  %252 = vst [vmem:[#allocation2 + $0xb8] sm:$0xff] %v1962_v0 }
  0x7a   : > { %253 = vst [vmem:[#allocation2 + $0xc0] sm:$0xff] %v1962_v0  ;;  %254 = vst [vmem:[#allocation2 + $0xc8] sm:$0xff] %v1962_v0 }
  0x7b   : > { %255 = vst [vmem:[#allocation2 + $0xd0] sm:$0xff] %v1962_v0  ;;  %256 = vst [vmem:[#allocation2 + $0xd8] sm:$0xff] %v1962_v0 }
  0x7c   : > { %257 = vst [vmem:[#allocation2 + $0xe0] sm:$0xff] %v1962_v0  ;;  %258 = vst [vmem:[#allocation2 + $0xe8] sm:$0xff] %v1962_v0 }
  0x7d   : > { %259 = vst [vmem:[#allocation2 + $0xf0] sm:$0xff] %v1962_v0  ;;  %260 = vst [vmem:[#allocation2 + $0xf8] sm:$0xff] %v1962_v0 }
  0x7e PF: > { %s1238_s26 = sshll.u32 %s1937_s18, 8  ;;  %v1723_v1 = vld [vmem:[%s2172_s6 + $0x4] ss:$8 sps:$4 sm:$0xff]   ;;  %v1721_v19 = vld [vmem:[%s2172_s6] ss:$8 sps:$4 sm:$0xff]   ;;  %p1288_p4 = scmp.ne.s32.totalorder %s1937_s18, 1 }
  0x7f   : > { %s262_s29 = sshra.s32 %s1238_s26, 3  ;;  %v1726_v2 = vld [vmem:[%s2172_s6 + $0x84] ss:$8 sps:$4 sm:$0xff]   ;;  %650 = vmatprep.mubr.bf16.mxu0 %v1723_v1  ;;  %v1724_v20 = vld [vmem:[%s2172_s6 + $0x80] ss:$8 sps:$4 sm:$0xff]  }
  0x80   : > { %s1239_s24 = sshll.u32 %s262_s29, 2  ;;  %714 = vmatprep.mubr.bf16.mxu1 %v1726_v2  ;;  %v1727_v21 = vld [vmem:[%s2172_s6 + $0x14] ss:$8 sps:$4 sm:$0xff]   ;;  %v1731_v23 = vld [vmem:[%s2172_s6 + $0x10] ss:$8 sps:$4 sm:$0xff]   ;;  %v298_v51 = vld [vmem:[#allocation2] sm:$0xff] }
  0x81   : > { %s2191_s7 = scalar_lea.vmem [#allocation6], %s1239_s24  ;;  %v1729_v22 = vld [vmem:[%s2172_s6 + $0x94] ss:$8 sps:$4 sm:$0xff]   ;;  %v1732_v24 = vld [vmem:[%s2172_s6 + $0x90] ss:$8 sps:$4 sm:$0xff]   ;;  %v314_v53 = vld [vmem:[#allocation2 + $0x80] sm:$0xff] }
  0x82   : > { %v1705_v3 = vld [vmem:[%s2191_s7 + $0x40] sm:$0xff]   ;;  %v1707_v5 = vld [vmem:[%s2191_s7 + $0x48] sm:$0xff]   ;;  %v1709_v7 = vld [vmem:[%s2191_s7 + $0x50] sm:$0xff]  }
  0x83   : > { %v1706_v4 = vld [vmem:[%s2191_s7] sm:$0xff]   ;;  %1456 = vmatprep.subr.bf16.mxu0 %v1705_v3  ;;  %1568 = vmatprep.subr.bf16.mxu1 %v1705_v3  ;;  %v1708_v6 = vld [vmem:[%s2191_s7 + $0x8] sm:$0xff]   ;;  %v1710_v8 = vld [vmem:[%s2191_s7 + $0x10] sm:$0xff]  }
  0x84   : > { %1457 = vmatpush3.bf16.msra.mxu0 %v1706_v4  ;;  %1576 = vmatpush3.bf16.msra.mxu1 %v1706_v4  ;;  %v1711_v9 = vld [vmem:[%s2191_s7 + $0x58] sm:$0xff]   ;;  %v1713_v11 = vld [vmem:[%s2191_s7 + $0x60] sm:$0xff]   ;;  %v1715_v13 = vld [vmem:[%s2191_s7 + $0x68] sm:$0xff]  }
  0x85   : > { %1458 = vmatprep.subr.bf16.mxu0 %v1707_v5  ;;  %1569 = vmatprep.subr.bf16.mxu1 %v1707_v5  ;;  %v1712_v10 = vld [vmem:[%s2191_s7 + $0x18] sm:$0xff]   ;;  %v1714_v12 = vld [vmem:[%s2191_s7 + $0x20] sm:$0xff]   ;;  %v1716_v14 = vld [vmem:[%s2191_s7 + $0x28] sm:$0xff]  }
  0x86   : > { %v1717_v15 = vld [vmem:[%s2191_s7 + $0x70] sm:$0xff]   ;;  %v1719_v17 = vld [vmem:[%s2191_s7 + $0x78] sm:$0xff]   ;;  %v1733_v25 = vld [vmem:[%s2172_s6 + $0x24] ss:$8 sps:$4 sm:$0xff]  }
  0x87   : > { %v1718_v16 = vld [vmem:[%s2191_s7 + $0x30] sm:$0xff]   ;;  %v1720_v18 = vld [vmem:[%s2191_s7 + $0x38] sm:$0xff]   ;;  %v1735_v26 = vld [vmem:[%s2172_s6 + $0xa4] ss:$8 sps:$4 sm:$0xff]  }
  0x88   : > { %1459 = vmatpush3.bf16.msra.mxu0 %v1708_v6  ;;  %1577 = vmatpush3.bf16.msra.mxu1 %v1708_v6  ;;  %v1737_v27 = vld [vmem:[%s2172_s6 + $0x20] ss:$8 sps:$4 sm:$0xff]   ;;  %v1739_v29 = vld [vmem:[%s2172_s6 + $0x34] ss:$8 sps:$4 sm:$0xff]   ;;  %v1743_v31 = vld [vmem:[%s2172_s6 + $0x30] ss:$8 sps:$4 sm:$0xff]  }
  0x89   : > { %1460 = vmatprep.subr.bf16.mxu0 %v1709_v7  ;;  %1570 = vmatprep.subr.bf16.mxu1 %v1709_v7  ;;  %v1738_v28 = vld [vmem:[%s2172_s6 + $0xa0] ss:$8 sps:$4 sm:$0xff]   ;;  %v1741_v30 = vld [vmem:[%s2172_s6 + $0xb4] ss:$8 sps:$4 sm:$0xff]   ;;  %v1744_v32 = vld [vmem:[%s2172_s6 + $0xb0] ss:$8 sps:$4 sm:$0xff]  }
  0x8a   : > { %v1745_v33 = vld [vmem:[%s2172_s6 + $0x44] ss:$8 sps:$4 sm:$0xff]   ;;  %v1749_v35 = vld [vmem:[%s2172_s6 + $0x40] ss:$8 sps:$4 sm:$0xff]   ;;  %v1751_v37 = vld [vmem:[%s2172_s6 + $0x54] ss:$8 sps:$4 sm:$0xff]  }
  0x8b   : > { %v1747_v34 = vld [vmem:[%s2172_s6 + $0xc4] ss:$8 sps:$4 sm:$0xff]   ;;  %v1750_v36 = vld [vmem:[%s2172_s6 + $0xc0] ss:$8 sps:$4 sm:$0xff]   ;;  %v1753_v38 = vld [vmem:[%s2172_s6 + $0xd4] ss:$8 sps:$4 sm:$0xff]  }
  0x8c   : > { %1461 = vmatpush3.bf16.msra.mxu0 %v1710_v8  ;;  %1578 = vmatpush3.bf16.msra.mxu1 %v1710_v8  ;;  %v1755_v39 = vld [vmem:[%s2172_s6 + $0x50] ss:$8 sps:$4 sm:$0xff]   ;;  %v1757_v41 = vld [vmem:[%s2172_s6 + $0x64] ss:$8 sps:$4 sm:$0xff]   ;;  %v1761_v43 = vld [vmem:[%s2172_s6 + $0x60] ss:$8 sps:$4 sm:$0xff]  }
  0x8d   : > { %1462 = vmatprep.subr.bf16.mxu0 %v1711_v9  ;;  %1571 = vmatprep.subr.bf16.mxu1 %v1711_v9  ;;  %v1756_v40 = vld [vmem:[%s2172_s6 + $0xd0] ss:$8 sps:$4 sm:$0xff]   ;;  %v1759_v42 = vld [vmem:[%s2172_s6 + $0xe4] ss:$8 sps:$4 sm:$0xff]   ;;  %v1762_v44 = vld [vmem:[%s2172_s6 + $0xe0] ss:$8 sps:$4 sm:$0xff]  }
  0x8e   : > { %v1763_v45 = vld [vmem:[%s2172_s6 + $0x74] ss:$8 sps:$4 sm:$0xff]   ;;  %v1767_v47 = vld [vmem:[%s2172_s6 + $0x70] ss:$8 sps:$4 sm:$0xff]   ;;  %v299_v59 = vld [vmem:[#allocation2 + $0x8] sm:$0xff] }
  0x8f   : > { %v1765_v46 = vld [vmem:[%s2172_s6 + $0xf4] ss:$8 sps:$4 sm:$0xff]   ;;  %v1768_v48 = vld [vmem:[%s2172_s6 + $0xf0] ss:$8 sps:$4 sm:$0xff]   ;;  %v315_v61 = vld [vmem:[#allocation2 + $0x88] sm:$0xff] }
  0x90   : > { %1463 = vmatpush3.bf16.msra.mxu0 %v1712_v10  ;;  %1579 = vmatpush3.bf16.msra.mxu1 %v1712_v10  ;;  %v300_v7 = vld [vmem:[#allocation2 + $0x10] sm:$0xff] }
  0x91   : > { %1464 = vmatprep.subr.bf16.mxu0 %v1713_v11  ;;  %1572 = vmatprep.subr.bf16.mxu1 %v1713_v11  ;;  %v316_v9 = vld [vmem:[#allocation2 + $0x90] sm:$0xff] }
  0x94   : > { %1465 = vmatpush3.bf16.msra.mxu0 %v1714_v12  ;;  %1580 = vmatpush3.bf16.msra.mxu1 %v1714_v12 }
  0x95   : > { %1466 = vmatprep.subr.bf16.mxu0 %v1715_v13  ;;  %1573 = vmatprep.subr.bf16.mxu1 %v1715_v13 }
  0x98   : > { %1467 = vmatpush3.bf16.msra.mxu0 %v1716_v14  ;;  %1581 = vmatpush3.bf16.msra.mxu1 %v1716_v14 }
  0x99   : > { %1468 = vmatprep.subr.bf16.mxu0 %v1717_v15  ;;  %1574 = vmatprep.subr.bf16.mxu1 %v1717_v15  ;;  %v301_v15 = vld [vmem:[#allocation2 + $0x18] sm:$0xff] }
  0x9c   : > { %1469 = vmatpush3.bf16.msra.mxu0 %v1718_v16  ;;  %1582 = vmatpush3.bf16.msra.mxu1 %v1718_v16 }
  0x9d   : > { %1470 = vmatprep.subr.bf16.mxu0 %v1719_v17  ;;  %1575 = vmatprep.subr.bf16.mxu1 %v1719_v17  ;;  %v317_v17 = vld [vmem:[#allocation2 + $0x98] sm:$0xff] }
  0xa0   : > { %1471 = vmatpush3.bf16.msra.mxu0 %v1720_v18  ;;  %1583 = vmatpush3.bf16.msra.mxu1 %v1720_v18 }
  0xa3   : > { %651 = vmatmul.mubr.bf16.vlgmr.msra.gmra.mrb[0].mxu0 %v1721_v19  ;;  %715 = vmatmul.mubr.bf16.vlgmr.msra.gmra.mrb[0].mxu1 %v1724_v20 }
  0xa4   : > { %658 = vmatprep.mubr.bf16.mxu0 %v1727_v21  ;;  %722 = vmatprep.mubr.bf16.mxu1 %v1729_v22 }
  0xab   : > { %659 = vmatmul.mubr.bf16.gmra.mrb[4].mxu0 %v1731_v23  ;;  %723 = vmatmul.mubr.bf16.gmra.mrb[4].mxu1 %v1732_v24 }
  0xac   : > { %666 = vmatprep.mubr.bf16.mxu0 %v1733_v25  ;;  %730 = vmatprep.mubr.bf16.mxu1 %v1735_v26 }
  0xb3   : > { %667 = vmatmul.mubr.bf16.gmra.mrb[8].mxu0 %v1737_v27  ;;  %731 = vmatmul.mubr.bf16.gmra.mrb[8].mxu1 %v1738_v28  ;;  %v302_v27 = vld [vmem:[#allocation2 + $0x20] sm:$0xff] }
  0xb4   : > { %674 = vmatprep.mubr.bf16.mxu0 %v1739_v29  ;;  %738 = vmatprep.mubr.bf16.mxu1 %v1741_v30  ;;  %v318_v29 = vld [vmem:[#allocation2 + $0xa0] sm:$0xff] }
  0xbb   : > { %675 = vmatmul.mubr.bf16.gmra.mrb[12].mxu0 %v1743_v31  ;;  %739 = vmatmul.mubr.bf16.gmra.mrb[12].mxu1 %v1744_v32 }
  0xbc   : > { %682 = vmatprep.mubr.bf16.mxu0 %v1745_v33  ;;  %746 = vmatprep.mubr.bf16.mxu1 %v1747_v34 }
  0xc3   : > { %683 = vmatmul.mubr.bf16.gmra.mrb[16].mxu0 %v1749_v35  ;;  %747 = vmatmul.mubr.bf16.gmra.mrb[16].mxu1 %v1750_v36  ;;  %v303_v35 = vld [vmem:[#allocation2 + $0x28] sm:$0xff] }
  0xc4   : > { %690 = vmatprep.mubr.bf16.mxu0 %v1751_v37  ;;  %754 = vmatprep.mubr.bf16.mxu1 %v1753_v38  ;;  %v319_v37 = vld [vmem:[#allocation2 + $0xa8] sm:$0xff] }
  0xcb   : > { %691 = vmatmul.mubr.bf16.gmra.mrb[20].mxu0 %v1755_v39  ;;  %755 = vmatmul.mubr.bf16.gmra.mrb[20].mxu1 %v1756_v40 }
  0xcc   : > { %698 = vmatprep.mubr.bf16.mxu0 %v1757_v41  ;;  %762 = vmatprep.mubr.bf16.mxu1 %v1759_v42 }
  0xd3   : > { %699 = vmatmul.mubr.bf16.gmra.mrb[24].mxu0 %v1761_v43  ;;  %763 = vmatmul.mubr.bf16.gmra.mrb[24].mxu1 %v1762_v44 }
  0xd4   : > { %706 = vmatprep.mubr.bf16.mxu0 %v1763_v45  ;;  %770 = vmatprep.mubr.bf16.mxu1 %v1765_v46 }
  0xdb   : > { %707 = vmatmul.mubr.bf16.gmra.mrb[28].mxu0 %v1767_v47  ;;  %771 = vmatmul.mubr.bf16.gmra.mrb[28].mxu1 %v1768_v48  ;;  %v304_v47 = vld [vmem:[#allocation2 + $0x30] sm:$0xff] }
 0x176   : > { %v1472_v49 = vpop.f32.mrb[0].mxu0  ;;  %v1520_v50 = vpop.f32.mrb[0].mxu1 }
 0x177   : > { %v1473_v52 = vpop.f32.mrb[1].mxu0  ;;  %v1521_v54 = vpop.f32.mrb[1].mxu1 }
 0x178   : > { %v1474_v55 = vadd.f32 %v1473_v52, %v1472_v49  ;;  %v1522_v56 = vadd.f32 %v1521_v54, %v1520_v50  ;;  %v1475_v57 = vpop.f32.mrb[2].mxu0  ;;  %v1523_v58 = vpop.f32.mrb[2].mxu1  ;;  %v320_v49 = vld [vmem:[#allocation2 + $0xb0] sm:$0xff] }
 0x179   : > { %v1476_v60 = vpop.f32.mrb[3].mxu0  ;;  %v1524_v62 = vpop.f32.mrb[3].mxu1 }
 0x17a   : > { %v779_v63 = vadd.f32 %v1474_v55, %v298_v51  ;;  %v795_v0 = vadd.f32 %v1522_v56, %v314_v53  ;;  %v1477_v1 = vadd.f32 %v1476_v60, %v1475_v57  ;;  %v1525_v2 = vadd.f32 %v1524_v62, %v1523_v58  ;;  %v305_v55 = vld [vmem:[#allocation2 + $0x38] sm:$0xff] }
 0x17b   : > { %v321_v57 = vld [vmem:[#allocation2 + $0xb8] sm:$0xff] }
 0x17c   : > { %811 = vst [vmem:[#allocation2] sm:$0xff] %v779_v63  ;;  %827 = vst [vmem:[#allocation2 + $0x80] sm:$0xff] %v795_v0  ;;  %v780_v3 = vadd.f32 %v1477_v1, %v299_v59  ;;  %v796_v4 = vadd.f32 %v1525_v2, %v315_v61 }
 0x17e   : > { %812 = vst [vmem:[#allocation2 + $0x8] sm:$0xff] %v780_v3  ;;  %828 = vst [vmem:[#allocation2 + $0x88] sm:$0xff] %v796_v4  ;;  %v1478_v5 = vpop.f32.mrb[4].mxu0  ;;  %v1526_v6 = vpop.f32.mrb[4].mxu1  ;;  %v306_v3 = vld [vmem:[#allocation2 + $0x40] sm:$0xff] }
 0x17f   : > { %v1479_v8 = vpop.f32.mrb[5].mxu0  ;;  %v1527_v10 = vpop.f32.mrb[5].mxu1 }
 0x180   : > { %v1480_v11 = vadd.f32 %v1479_v8, %v1478_v5  ;;  %v1528_v12 = vadd.f32 %v1527_v10, %v1526_v6  ;;  %v1481_v13 = vpop.f32.mrb[6].mxu0  ;;  %v1529_v14 = vpop.f32.mrb[6].mxu1  ;;  %v322_v5 = vld [vmem:[#allocation2 + $0xc0] sm:$0xff] }
 0x181   : > { %v1482_v16 = vpop.f32.mrb[7].mxu0  ;;  %v1530_v18 = vpop.f32.mrb[7].mxu1 }
 0x182   : > { %v781_v19 = vadd.f32 %v1480_v11, %v300_v7  ;;  %v797_v20 = vadd.f32 %v1528_v12, %v316_v9  ;;  %v1483_v21 = vadd.f32 %v1482_v16, %v1481_v13  ;;  %v1531_v22 = vadd.f32 %v1530_v18, %v1529_v14  ;;  %v307_v11 = vld [vmem:[#allocation2 + $0x48] sm:$0xff] }
 0x183   : > { %v323_v13 = vld [vmem:[#allocation2 + $0xc8] sm:$0xff] }
 0x184   : > { %813 = vst [vmem:[#allocation2 + $0x10] sm:$0xff] %v781_v19  ;;  %829 = vst [vmem:[#allocation2 + $0x90] sm:$0xff] %v797_v20  ;;  %v782_v23 = vadd.f32 %v1483_v21, %v301_v15  ;;  %v798_v24 = vadd.f32 %v1531_v22, %v317_v17 }
 0x186   : > { %814 = vst [vmem:[#allocation2 + $0x18] sm:$0xff] %v782_v23  ;;  %830 = vst [vmem:[#allocation2 + $0x98] sm:$0xff] %v798_v24  ;;  %v1484_v25 = vpop.f32.mrb[8].mxu0  ;;  %v1532_v26 = vpop.f32.mrb[8].mxu1  ;;  %v308_v23 = vld [vmem:[#allocation2 + $0x50] sm:$0xff] }
 0x187   : > { %v1485_v28 = vpop.f32.mrb[9].mxu0  ;;  %v1533_v30 = vpop.f32.mrb[9].mxu1 }
 0x188   : > { %v1486_v31 = vadd.f32 %v1485_v28, %v1484_v25  ;;  %v1534_v32 = vadd.f32 %v1533_v30, %v1532_v26  ;;  %v1487_v33 = vpop.f32.mrb[10].mxu0  ;;  %v1535_v34 = vpop.f32.mrb[10].mxu1  ;;  %v324_v25 = vld [vmem:[#allocation2 + $0xd0] sm:$0xff] }
 0x189   : > { %v1488_v36 = vpop.f32.mrb[11].mxu0  ;;  %v1536_v38 = vpop.f32.mrb[11].mxu1 }
 0x18a   : > { %v783_v39 = vadd.f32 %v1486_v31, %v302_v27  ;;  %v799_v40 = vadd.f32 %v1534_v32, %v318_v29  ;;  %v1489_v41 = vadd.f32 %v1488_v36, %v1487_v33  ;;  %v1537_v42 = vadd.f32 %v1536_v38, %v1535_v34  ;;  %v309_v31 = vld [vmem:[#allocation2 + $0x58] sm:$0xff] }
 0x18b   : > { %v325_v33 = vld [vmem:[#allocation2 + $0xd8] sm:$0xff] }
 0x18c   : > { %815 = vst [vmem:[#allocation2 + $0x20] sm:$0xff] %v783_v39  ;;  %831 = vst [vmem:[#allocation2 + $0xa0] sm:$0xff] %v799_v40  ;;  %v784_v43 = vadd.f32 %v1489_v41, %v303_v35  ;;  %v800_v44 = vadd.f32 %v1537_v42, %v319_v37 }
 0x18e   : > { %816 = vst [vmem:[#allocation2 + $0x28] sm:$0xff] %v784_v43  ;;  %832 = vst [vmem:[#allocation2 + $0xa8] sm:$0xff] %v800_v44  ;;  %v1490_v45 = vpop.f32.mrb[12].mxu0  ;;  %v1538_v46 = vpop.f32.mrb[12].mxu1  ;;  %v310_v43 = vld [vmem:[#allocation2 + $0x60] sm:$0xff] }
 0x18f   : > { %v1491_v48 = vpop.f32.mrb[13].mxu0  ;;  %v1539_v50 = vpop.f32.mrb[13].mxu1 }
 0x190   : > { %v1492_v51 = vadd.f32 %v1491_v48, %v1490_v45  ;;  %v1540_v52 = vadd.f32 %v1539_v50, %v1538_v46  ;;  %v1493_v53 = vpop.f32.mrb[14].mxu0  ;;  %v1541_v54 = vpop.f32.mrb[14].mxu1  ;;  %v326_v45 = vld [vmem:[#allocation2 + $0xe0] sm:$0xff] }
 0x191   : > { %v1494_v56 = vpop.f32.mrb[15].mxu0  ;;  %v1542_v58 = vpop.f32.mrb[15].mxu1 }
 0x192   : > { %v785_v59 = vadd.f32 %v1492_v51, %v304_v47  ;;  %v801_v60 = vadd.f32 %v1540_v52, %v320_v49  ;;  %v1495_v61 = vadd.f32 %v1494_v56, %v1493_v53  ;;  %v1543_v62 = vadd.f32 %v1542_v58, %v1541_v54  ;;  %v311_v51 = vld [vmem:[#allocation2 + $0x68] sm:$0xff] }
 0x193   : > { %v327_v53 = vld [vmem:[#allocation2 + $0xe8] sm:$0xff] }
 0x194   : > { %817 = vst [vmem:[#allocation2 + $0x30] sm:$0xff] %v785_v59  ;;  %833 = vst [vmem:[#allocation2 + $0xb0] sm:$0xff] %v801_v60  ;;  %v786_v63 = vadd.f32 %v1495_v61, %v305_v55  ;;  %v802_v0 = vadd.f32 %v1543_v62, %v321_v57 }
 0x196   : > { %818 = vst [vmem:[#allocation2 + $0x38] sm:$0xff] %v786_v63  ;;  %834 = vst [vmem:[#allocation2 + $0xb8] sm:$0xff] %v802_v0  ;;  %v1496_v1 = vpop.f32.mrb[16].mxu0  ;;  %v1544_v2 = vpop.f32.mrb[16].mxu1  ;;  %v312_v63 = vld [vmem:[#allocation2 + $0x70] sm:$0xff] }
 0x197   : > { %v1497_v4 = vpop.f32.mrb[17].mxu0  ;;  %v1545_v6 = vpop.f32.mrb[17].mxu1 }
 0x198   : > { %v1498_v7 = vadd.f32 %v1497_v4, %v1496_v1  ;;  %v1546_v8 = vadd.f32 %v1545_v6, %v1544_v2  ;;  %v1499_v9 = vpop.f32.mrb[18].mxu0  ;;  %v1547_v10 = vpop.f32.mrb[18].mxu1  ;;  %v328_v1 = vld [vmem:[#allocation2 + $0xf0] sm:$0xff] }
 0x199   : > { %v1500_v12 = vpop.f32.mrb[19].mxu0  ;;  %v1548_v14 = vpop.f32.mrb[19].mxu1 }
 0x19a   : > { %v787_v15 = vadd.f32 %v1498_v7, %v306_v3  ;;  %v803_v16 = vadd.f32 %v1546_v8, %v322_v5  ;;  %v1501_v17 = vadd.f32 %v1500_v12, %v1499_v9  ;;  %v1549_v18 = vadd.f32 %v1548_v14, %v1547_v10  ;;  %v313_v7 = vld [vmem:[#allocation2 + $0x78] sm:$0xff] }
 0x19b   : > { %v329_v9 = vld [vmem:[#allocation2 + $0xf8] sm:$0xff] }
 0x19c   : > { %819 = vst [vmem:[#allocation2 + $0x40] sm:$0xff] %v787_v15  ;;  %835 = vst [vmem:[#allocation2 + $0xc0] sm:$0xff] %v803_v16  ;;  %v788_v19 = vadd.f32 %v1501_v17, %v307_v11  ;;  %v804_v20 = vadd.f32 %v1549_v18, %v323_v13  ;;  %v847_v17 = vld [vmem:[#allocation2] sm:$0xff] (!%p1288_p4)  ;;  %v848_v18 = vld [vmem:[#allocation2 + $0x8] sm:$0xff] (!%p1288_p4) }
 0x19e   : > { %820 = vst [vmem:[#allocation2 + $0x48] sm:$0xff] %v788_v19  ;;  %836 = vst [vmem:[#allocation2 + $0xc8] sm:$0xff] %v804_v20  ;;  %v1502_v21 = vpop.f32.mrb[20].mxu0  ;;  %v1550_v22 = vpop.f32.mrb[20].mxu1  ;;  %v2243_v19 = vld [vmem:[%s2367_s2] ss:$0 sm:$0xff] (!%p1288_p4) }
 0x19f   : > { %v1503_v24 = vpop.f32.mrb[21].mxu0  ;;  %v1551_v26 = vpop.f32.mrb[21].mxu1  ;;  %v886_v20 = vadd.f32 (!%p1288_p4), %v2243_v19, %v847_v17  ;;  %v869_v17 = vld [vmem:[#allocation2 + $0xb0] sm:$0xff] (!%p1288_p4) }
 0x1a0   : > { %v1504_v27 = vadd.f32 %v1503_v24, %v1502_v21  ;;  %v1552_v28 = vadd.f32 %v1551_v26, %v1550_v22  ;;  %v1505_v29 = vpop.f32.mrb[22].mxu0  ;;  %v1553_v30 = vpop.f32.mrb[22].mxu1  ;;  %v887_v21 = vadd.f32 (!%p1288_p4), %v2243_v19, %v848_v18  ;;  %v849_v22 = vld [vmem:[#allocation2 + $0x10] sm:$0xff] (!%p1288_p4)  ;;  %v851_v24 = vld [vmem:[#allocation2 + $0x20] sm:$0xff] (!%p1288_p4)  ;;  %v870_v18 = vld [vmem:[#allocation2 + $0xb8] sm:$0xff] (!%p1288_p4) }
 0x1a1   : > { %v1506_v32 = vpop.f32.mrb[23].mxu0  ;;  %v1554_v34 = vpop.f32.mrb[23].mxu1 }
 0x1a2   : > { %v789_v35 = vadd.f32 %v1504_v27, %v308_v23  ;;  %v805_v36 = vadd.f32 %v1552_v28, %v324_v25  ;;  %v1507_v37 = vadd.f32 %v1506_v32, %v1505_v29  ;;  %v1555_v38 = vadd.f32 %v1554_v34, %v1553_v30  ;;  %v850_v23 = vld [vmem:[#allocation2 + $0x18] sm:$0xff] (!%p1288_p4)  ;;  %v852_v27 = vld [vmem:[#allocation2 + $0x28] sm:$0xff] (!%p1288_p4)  ;;  %v853_v29 = vld [vmem:[#allocation2 + $0x30] sm:$0xff] (!%p1288_p4) }
 0x1a3   : > { %v888_v25 = vadd.f32 (!%p1288_p4), %v2243_v19, %v849_v22  ;;  %v889_v26 = vadd.f32 (!%p1288_p4), %v2243_v19, %v850_v23  ;;  %v890_v28 = vadd.f32 (!%p1288_p4), %v2243_v19, %v851_v24  ;;  %v854_v30 = vld [vmem:[#allocation2 + $0x38] sm:$0xff] (!%p1288_p4)  ;;  %v919_v32 = vmax.f32 (!%p1288_p4), %v887_v21, 0.0  ;;  %v871_v24 = vld [vmem:[#allocation2 + $0xc0] sm:$0xff] (!%p1288_p4) }
 0x1a4   : > { %821 = vst [vmem:[#allocation2 + $0x50] sm:$0xff] %v789_v35  ;;  %837 = vst [vmem:[#allocation2 + $0xd0] sm:$0xff] %v805_v36  ;;  %v790_v39 = vadd.f32 %v1507_v37, %v309_v31  ;;  %v806_v40 = vadd.f32 %v1555_v38, %v325_v33  ;;  %v918_v31 = vmax.f32 (!%p1288_p4), %v886_v20, 0.0  ;;  %v891_v33 = vadd.f32 (!%p1288_p4), %v2243_v19, %v852_v27  ;;  %v855_v35 = vld [vmem:[#allocation2 + $0x40] sm:$0xff] (!%p1288_p4) }
 0x1a5   : > { %v892_v34 = vadd.f32 (!%p1288_p4), %v2243_v19, %v853_v29  ;;  %v856_v36 = vld [vmem:[#allocation2 + $0x48] sm:$0xff] (!%p1288_p4)  ;;  %v920_v38 = vmax.f32 (!%p1288_p4), %v888_v25, 0.0 }
 0x1a6   : > { %822 = vst [vmem:[#allocation2 + $0x58] sm:$0xff] %v790_v39  ;;  %838 = vst [vmem:[#allocation2 + $0xd8] sm:$0xff] %v806_v40  ;;  %v1508_v41 = vpop.f32.mrb[24].mxu0  ;;  %v1556_v42 = vpop.f32.mrb[24].mxu1  ;;  %v921_v39 = vmax.f32 (!%p1288_p4), %v889_v26, 0.0  ;;  %v922_v40 = vmax.f32 (!%p1288_p4), %v890_v28, 0.0 }
 0x1a7   : > { %v1509_v44 = vpop.f32.mrb[25].mxu0  ;;  %v1557_v46 = vpop.f32.mrb[25].mxu1  ;;  %v872_v25 = vld [vmem:[#allocation2 + $0xc8] sm:$0xff] (!%p1288_p4) }
 0x1a8   : > { %v1510_v47 = vadd.f32 %v1509_v44, %v1508_v41  ;;  %v1558_v48 = vadd.f32 %v1557_v46, %v1556_v42  ;;  %v1511_v49 = vpop.f32.mrb[26].mxu0  ;;  %v1559_v50 = vpop.f32.mrb[26].mxu1  ;;  %v893_v41 = vadd.f32 (!%p1288_p4), %v2243_v19, %v854_v30  ;;  %v1364_v44 = vpack.c.bf16 (!%p1288_p4), %v919_v32, %v918_v31 }
 0x1a9   : > { %v1512_v52 = vpop.f32.mrb[27].mxu0  ;;  %v1560_v54 = vpop.f32.mrb[27].mxu1  ;;  %v924_v46 = vmax.f32 (!%p1288_p4), %v892_v34, 0.0  ;;  %v909_v34 = vadd.f32 (!%p1288_p4), %v2243_v19, %v870_v18 }
 0x1aa   : > { %v791_v55 = vadd.f32 %v1510_v47, %v310_v43  ;;  %v807_v56 = vadd.f32 %v1558_v48, %v326_v45  ;;  %v1513_v57 = vadd.f32 %v1512_v52, %v1511_v49  ;;  %v1561_v58 = vadd.f32 %v1560_v54, %v1559_v50  ;;  %1365 = vst [vmem:[%s2185_s9] sm:$0xff] (!%p1288_p4), %v1364_v44  }
 0x1ab   : > { %v857_v37 = vld [vmem:[#allocation2 + $0x50] sm:$0xff] (!%p1288_p4)  ;;  %v923_v45 = vmax.f32 (!%p1288_p4), %v891_v33, 0.0  ;;  %v894_v47 = vadd.f32 (!%p1288_p4), %v2243_v19, %v855_v35  ;;  %v1369_v49 = vpack.c.bf16 (!%p1288_p4), %v921_v39, %v920_v38  ;;  %v925_v50 = vmax.f32 (!%p1288_p4), %v893_v41, 0.0 }
 0x1ac   : > { %823 = vst [vmem:[#allocation2 + $0x60] sm:$0xff] %v791_v55  ;;  %839 = vst [vmem:[#allocation2 + $0xe0] sm:$0xff] %v807_v56  ;;  %v792_v59 = vadd.f32 %v1513_v57, %v311_v51  ;;  %v808_v60 = vadd.f32 %v1561_v58, %v327_v53  ;;  %v895_v51 = vadd.f32 (!%p1288_p4), %v2243_v19, %v856_v36  ;;  %v873_v30 = vld [vmem:[#allocation2 + $0xd0] sm:$0xff] (!%p1288_p4)  ;;  %v941_v44 = vmax.f32 (!%p1288_p4), %v909_v34, 0.0 }
 0x1ad   : > { %v858_v42 = vld [vmem:[#allocation2 + $0x58] sm:$0xff] (!%p1288_p4)  ;;  %v896_v52 = vadd.f32 (!%p1288_p4), %v2243_v19, %v857_v37  ;;  %v1374_v55 = vpack.c.bf16 (!%p1288_p4), %v923_v45, %v922_v40  ;;  %v926_v56 = vmax.f32 (!%p1288_p4), %v894_v47, 0.0  ;;  %1441 = vst [vmem:[%s2185_s9 + $0x8] sm:$0xff] (!%p1288_p4), %v1369_v49   ;;  %v908_v33 = vadd.f32 (!%p1288_p4), %v2243_v19, %v869_v17 }
 0x1ae   : > { %824 = vst [vmem:[#allocation2 + $0x68] sm:$0xff] %v792_v59  ;;  %840 = vst [vmem:[#allocation2 + $0xe8] sm:$0xff] %v808_v60  ;;  %v1514_v61 = vpop.f32.mrb[28].mxu0  ;;  %v1562_v62 = vpop.f32.mrb[28].mxu1  ;;  %v897_v57 = vadd.f32 (!%p1288_p4), %v2243_v19, %v858_v42  ;;  %v863_v59 = vld [vmem:[#allocation2 + $0x80] sm:$0xff] (!%p1288_p4)  ;;  %v864_v60 = vld [vmem:[#allocation2 + $0x88] sm:$0xff] (!%p1288_p4)  ;;  %v910_v38 = vadd.f32 (!%p1288_p4), %v2243_v19, %v871_v24  ;;  %v911_v39 = vadd.f32 (!%p1288_p4), %v2243_v19, %v872_v25 }
 0x1af   : > { %v1515_v0 = vpop.f32.mrb[29].mxu0  ;;  %v1563_v2 = vpop.f32.mrb[29].mxu1  ;;  %1442 = vst [vmem:[%s2185_s9 + $0x10] sm:$0xff] (!%p1288_p4), %v1374_v55   ;;  %v874_v35 = vld [vmem:[#allocation2 + $0xd8] sm:$0xff] (!%p1288_p4)  ;;  %v912_v45 = vadd.f32 (!%p1288_p4), %v2243_v19, %v873_v30 }
 0x1b0   : > { %v1516_v3 = vadd.f32 %v1515_v0, %v1514_v61  ;;  %v1564_v4 = vadd.f32 %v1563_v2, %v1562_v62  ;;  %v1517_v5 = vpop.f32.mrb[30].mxu0  ;;  %v1565_v6 = vpop.f32.mrb[30].mxu1  ;;  %846 = sbr.rel (%p1288_p4) target bundleno = 454 (0x1c6), region = 48  ;;  %v1379_v61 = vpack.c.bf16 (!%p1288_p4), %v925_v50, %v924_v46  ;;  %v927_v62 = vmax.f32 (!%p1288_p4), %v895_v51, 0.0 }
 0x1b1   : > { %v1518_v8 = vpop.f32.mrb[31].mxu0  ;;  %v1566_v10 = vpop.f32.mrb[31].mxu1  ;;  %v929_v2 = vmax.f32 (!%p1288_p4), %v897_v57, 0.0  ;;  %v942_v49 = vmax.f32 (!%p1288_p4), %v910_v38, 0.0  ;;  %v943_v50 = vmax.f32 (!%p1288_p4), %v911_v39, 0.0  ;;  %v913_v51 = vadd.f32 (!%p1288_p4), %v2243_v19, %v874_v35 }
 0x1b2   : > { %v793_v11 = vadd.f32 %v1516_v3, %v312_v63  ;;  %v809_v12 = vadd.f32 %v1564_v4, %v328_v1  ;;  %v1519_v13 = vadd.f32 %v1518_v8, %v1517_v5  ;;  %v1567_v14 = vadd.f32 %v1566_v10, %v1565_v6  ;;  %v865_v1 = vld [vmem:[#allocation2 + $0x90] sm:$0xff] (!%p1288_p4)  ;;  %v866_v6 = vld [vmem:[#allocation2 + $0x98] sm:$0xff] (!%p1288_p4)  ;;  %1443 = vst [vmem:[%s2185_s9 + $0x18] sm:$0xff] (!%p1288_p4), %v1379_v61  }
 0x1b3   : > { %v859_v43 = vld [vmem:[#allocation2 + $0x60] sm:$0xff] (!%p1288_p4)  ;;  %v928_v63 = vmax.f32 (!%p1288_p4), %v896_v52, 0.0  ;;  %v903_v10 = vadd.f32 (!%p1288_p4), %v2243_v19, %v864_v60  ;;  %v905_v23 = vadd.f32 (!%p1288_p4), %v2243_v19, %v866_v6  ;;  %v945_v57 = vmax.f32 (!%p1288_p4), %v913_v51, 0.0 }
 0x1b4   : > { %825 = vst [vmem:[#allocation2 + $0x70] sm:$0xff] %v793_v11  ;;  %841 = vst [vmem:[#allocation2 + $0xf0] sm:$0xff] %v809_v12  ;;  %v794_v15 = vadd.f32 %v1519_v13, %v313_v7  ;;  %v810_v16 = vadd.f32 %v1567_v14, %v329_v9  ;;  %v898_v58 = vadd.f32 (!%p1288_p4), %v2243_v19, %v859_v43  ;;  %v867_v11 = vld [vmem:[#allocation2 + $0xa0] sm:$0xff] (!%p1288_p4)  ;;  %v868_v12 = vld [vmem:[#allocation2 + $0xa8] sm:$0xff] (!%p1288_p4)  ;;  %v940_v43 = vmax.f32 (!%p1288_p4), %v908_v33, 0.0 }
 0x1b5   : > { %v860_v48 = vld [vmem:[#allocation2 + $0x68] sm:$0xff] (!%p1288_p4)  ;;  %v1384_v7 = vpack.c.bf16 (!%p1288_p4), %v927_v62, %v926_v56  ;;  %v902_v9 = vadd.f32 (!%p1288_p4), %v2243_v19, %v863_v59  ;;  %v1389_v13 = vpack.c.bf16 (!%p1288_p4), %v929_v2, %v928_v63  ;;  %v935_v22 = vmax.f32 (!%p1288_p4), %v903_v10, 0.0  ;;  %v875_v40 = vld [vmem:[#allocation2 + $0xe0] sm:$0xff] (!%p1288_p4) }
 0x1b6   : > { %826 = vst [vmem:[#allocation2 + $0x78] sm:$0xff] %v794_v15  ;;  %842 = vst [vmem:[#allocation2 + $0xf8] sm:$0xff] %v810_v16  ;;  %v899_v0 = vadd.f32 (!%p1288_p4), %v2243_v19, %v860_v48  ;;  %v930_v3 = vmax.f32 (!%p1288_p4), %v898_v58, 0.0  ;;  %v904_v16 = vadd.f32 (!%p1288_p4), %v2243_v19, %v865_v1  ;;  %v906_v28 = vadd.f32 (!%p1288_p4), %v2243_v19, %v867_v11  ;;  %v876_v41 = vld [vmem:[#allocation2 + $0xe8] sm:$0xff] (!%p1288_p4) }
 0x1b7   : > { %1444 = vst [vmem:[%s2185_s9 + $0x20] sm:$0xff] %v1384_v7   ;;  %v934_v21 = vmax.f32 %v902_v9, 0.0  ;;  %1445 = vst [vmem:[%s2185_s9 + $0x28] sm:$0xff] %v1389_v13   ;;  %v907_v29 = vadd.f32 %v2243_v19, %v868_v12  ;;  %v937_v32 = vmax.f32 %v905_v23, 0.0  ;;  %v1419_v52 = vpack.c.bf16 %v941_v44, %v940_v43 }
 0x1b8   : > { %v931_v8 = vmax.f32 %v899_v0, 0.0  ;;  %v936_v27 = vmax.f32 %v904_v16, 0.0  ;;  %v938_v36 = vmax.f32 %v906_v28, 0.0  ;;  %v915_v55 = vadd.f32 %v2243_v19, %v876_v41 }
 0x1b9   : > { %v1404_v31 = vpack.c.bf16 %v935_v22, %v934_v21  ;;  %v939_v37 = vmax.f32 %v907_v29, 0.0  ;;  %v1424_v56 = vpack.c.bf16 %v943_v50, %v942_v49  ;;  %1451 = vst [vmem:[%s2185_s9 + $0x58] sm:$0xff] %v1419_v52  }
 0x1ba   : > { %v1394_v20 = vpack.c.bf16 %v931_v8, %v930_v3  ;;  %v1409_v42 = vpack.c.bf16 %v937_v32, %v936_v27  ;;  %v947_v61 = vmax.f32 %v915_v55, 0.0 }
 0x1bb   : > { %v861_v53 = vld [vmem:[#allocation2 + $0x70] sm:$0xff]  ;;  %1448 = vst [vmem:[%s2185_s9 + $0x40] sm:$0xff] %v1404_v31   ;;  %v1414_v48 = vpack.c.bf16 %v939_v37, %v938_v36  ;;  %1452 = vst [vmem:[%s2185_s9 + $0x60] sm:$0xff] %v1424_v56  }
 0x1bc   : > { %v900_v4 = vadd.f32 %v2243_v19, %v861_v53  ;;  %1446 = vst [vmem:[%s2185_s9 + $0x30] sm:$0xff] %v1394_v20   ;;  %v877_v46 = vld [vmem:[#allocation2 + $0xf0] sm:$0xff]  ;;  %1449 = vst [vmem:[%s2185_s9 + $0x48] sm:$0xff] %v1409_v42   ;;  %v944_v53 = vmax.f32 %v912_v45, 0.0 }
 0x1bd   : > { %v862_v54 = vld [vmem:[#allocation2 + $0x78] sm:$0xff]  ;;  %1450 = vst [vmem:[%s2185_s9 + $0x50] sm:$0xff] %v1414_v48   ;;  %v916_v58 = vadd.f32 %v2243_v19, %v877_v46 }
 0x1be   : > { %v901_v5 = vadd.f32 %v2243_v19, %v862_v54  ;;  %v932_v14 = vmax.f32 %v900_v4, 0.0  ;;  %v878_v47 = vld [vmem:[#allocation2 + $0xf8] sm:$0xff]  ;;  %v914_v54 = vadd.f32 %v2243_v19, %v875_v40  ;;  %v1429_v62 = vpack.c.bf16 %v945_v57, %v944_v53 }
 0x1bf   : > { %v917_v59 = vadd.f32 %v2243_v19, %v878_v47  ;;  %v948_v63 = vmax.f32 %v916_v58, 0.0 }
 0x1c0   : > { %v933_v15 = vmax.f32 %v901_v5, 0.0  ;;  %v946_v60 = vmax.f32 %v914_v54, 0.0  ;;  %1453 = vst [vmem:[%s2185_s9 + $0x68] sm:$0xff] %v1429_v62  }
 0x1c1   : > { %v949_v0 = vmax.f32 %v917_v59, 0.0 }
 0x1c2   : > { %v1399_v26 = vpack.c.bf16 %v933_v15, %v932_v14  ;;  %v1434_v1 = vpack.c.bf16 %v947_v61, %v946_v60 }
 0x1c3   : > { %v1439_v2 = vpack.c.bf16 %v949_v0, %v948_v63 }
 0x1c4   : > { %1447 = vst [vmem:[%s2185_s9 + $0x38] sm:$0xff] %v1399_v26   ;;  %1454 = vst [vmem:[%s2185_s9 + $0x70] sm:$0xff] %v1434_v1  }
 0x1c5   : > { %1455 = vst [vmem:[%s2185_s9 + $0x78] sm:$0xff] %v1439_v2  }
 0x1c6 PF: > { %s1360_s18 = sshll.u32 %s1941_s19, 11  ;;  %s1124_s12 = sshll.u32 %s2185_s9, 4  ;;  %s2300_s12 = int_to_ptr.vmem [resolvable:$true] %s1124_s12 }
 0x1c7   : > { %s2297_s1 = scalar_lea.hbm %s2368_s3, %s1360_s18  ;;  %s2304_s23 = scalar_lea.sflag [#allocation5], %s218_s20 }
 0x1c8   : > { %s1827_s10 = scalar_lea.vmem %s2300_s12, 2048  ;;  %p2401_p3 = scmp.ne.s32.totalorder %s2386_s30, 0 }
 0x1c9   : > { %p1828_p2 = scmp.ne.s32.totalorder %s2300_s12, %s1827_s10  ;;  %s1963_s19 = smov [#allocation8]  }
 0x1ca   : > { %s1831_s25 = sshll.u32 %s1963_s19, 4  ;;  %s1832_s25 = int_to_ptr.vmem [resolvable:$false] %s1831_s25 }
 0x1cb   : > { %p1829_p6 = pnand %p1828_p2, %p2401_p3  ;;  %s1833_s6 = scalar_lea.vmem %s1832_s25, 4096 }
 0x1cc   : > { %p1834_p12 = scmp.lt.s32.totalorder %s2300_s12, %s1832_s25  ;;  %p1835_p0 = scmp.lt.s32.totalorder %s1833_s6, %s1827_s10 }
 0x1cd   : > { %p1830_p10 = pneg %p1829_p6 }
 0x1ce   : > { %p1836_p8 = por %p1835_p0, %p1834_p12 }
 0x1d0   : > { %p1837_p11 = pnand %p1836_p8, %p1830_p10 }
 0x1d2   : > { %1840 = shalt.err (!%p1837_p11)
}
 0x1d3   : > { %s1841_s20 = scalar_lea.hbm %s2297_s1, 2048  ;;  %s1845_s26 = scalar_lea.hbm %s2368_s3, 4096 }
 0x1d4   : > { %p1842_p13 = scmp.ne.s32.totalorder %s2297_s1, %s1841_s20  ;;  %p1846_p1 = scmp.lt.u32.totalorder %s2297_s1, %s2368_s3 }
 0x1d5   : > { %p1847_p5 = scmp.lt.u32.totalorder %s1845_s26, %s1841_s20  ;;  %p1849_p2 = scmp.lt.u32.totalorder %s1841_s20, %s2297_s1 }
 0x1d6   : > { %p1843_p7 = pnand %p1842_p13, %p2401_p3 }
 0x1d7   : > { %p1848_p4 = por %p1847_p5, %p1846_p1 }
 0x1d8   : > { %p1844_p9 = pneg %p1843_p7 }
 0x1d9   : > { %p1850_p6 = por %p1849_p2, %p1848_p4 }
 0x1db   : > { %p1851_p10 = pnand %p1850_p6, %p1844_p9 }
 0x1dd   : > { %1854 = shalt.err (!%p1851_p10)
}
 0x1de   : > { %s1964_s7 = smov 64   ;;  %s1965_s15 = smov 4  }
 0x1df   : > { %1590 = dma.vmem_to_hbm [thread:$0]  (%p2401_p3), %s2300_s12, 2048, %s2297_s1, %s2304_s23, %s1964_s7, %s1964_s7, %s1965_s15  }
 0x1e0 PF: > { %s2402_s28 = sld [smem:[#allocation12_spill]]  ;;  %s2403_s18 = sld [smem:[#allocation14_spill]] }
 0x1e1   : > { %p1607_p12 = scmp.ge.s32.totalorder %s1953_s22, 2 }
 0x1e6   : > { %s1139_s4 = sand.u32 1, %s2402_s28   ;;  %p2404_p0 = scmp.ne.s32.totalorder %s2403_s18, 0 }
 0x1e7   : > { %s1140_s27 = scalar_lea.sflag [#allocation5], %s1139_s4 }
 0x1e8   : > { %p1601_p8 = pnand %p1607_p12, %p2404_p0 }
 0x1ea   : > { %1908 = dma.done.wait (!%p1601_p8), %s1140_s27, 2048  }
 0x1eb   : > { %1910 = vsyncadd (!%p1601_p8), %s1140_s27, 4294965248  ;;  %s20_s22 = sadd.s32 1, %s1953_s22   ;;  %s2405_s18 = sld [smem:[#allocation13_spill]] }
 0x1ec   : > { %p17_p11 = scmp.ge.s32.totalorder %s20_s22, 6   ;;  %s2406_s20 = sld [smem:[#allocation15_spill]] }
 0x1ed   : > { %s2407_s30 = sld [smem:[#allocation16_spill]]  ;;  %s2408_s12 = smov %s1917_s13 }
 0x1ee   : > { %s2409_s13 = smov %s1921_s14  ;;  %s2410_s14 = smov %s2134_s11 }
 0x1ef   : > { %s2411_s15 = smov %s1929_s16  ;;  %s2412_s16 = smov %s1933_s17 }
 0x1f0   : > { %s2413_s17 = smov %s2139_s8  ;;  %s2414_s19 = smov %s1949_s21 }
 0x1f1   :  { %19 = sbr.rel (!%p17_p11) target bundleno = 12 (0xc), region = 90 }
 0x1f3   : > { %s2415_s21 = smov %s2407_s30 }
 0x1f8   :  { %1145 = vsyncpa [#allocation4], 1 }
 0x1f9   :  { %1147 = vsyncpa [#allocation4 + $0x1], 1 }
 0x1fa   :  { %1148 = vsyncpa [#allocation7], 1 }
 0x1fb   :  { %1149 = vsyncpa [#allocation5], 1 }
 0x1fc   :  { %1151 = vsyncpa [#allocation5 + $0x1], 1 }

</bundles_post_ra>
